<compile_context>
chip_gen: v6e
topology: v6e:2x2x1
jax: 0.10.0
libtpu: 0.0.40
codegen_flags: <defaults>
</compile_context>

<pallas_src>
import jax
import jax.numpy as jnp
from jax.experimental import pallas as pl
from jax.experimental.pallas import tpu as pltpu

KH, KW = 4, 4
IN_CH, OUT_CH = 3, 64


def _round_up(x, m):
    return (x + m - 1) // m * m


def _matmul_bias_relu6_kernel(p_ref, w_ref, b_ref, o_ref):
    # p_ref: (TM, K)   im2col patch rows (K = KH*KW*IC = 48, full-dim block)
    # w_ref: (K, OC)   flattened HWIO weights, resident in VMEM
    # b_ref: (1, OC)   bias row
    # o_ref: (TM, OC)  output block
    acc = jnp.dot(p_ref[...], w_ref[...], preferred_element_type=jnp.float32)
    acc = acc + b_ref[...]
    o_ref[...] = jnp.clip(acc, 0.0, 6.0).astype(o_ref.dtype)  # ReLU6


def relu6_conv_block(x_nchw, weight_oihw, bias, *, tm=1024):
    """x_nchw: (N, C, H, W) f32; weight_oihw: (OC, IC, KH, KW); bias: (OC,)."""
    n, c, h, w = x_nchw.shape
    oc, ic, kh, kw = weight_oihw.shape
    assert c == ic
    oh, ow = h - kh + 1, w - kw + 1

    # ---------- wrapper-side im2col (pure layout, no kernel compute) ----------
    x_nhwc = jnp.transpose(x_nchw, (0, 2, 3, 1))                     # (N, H, W, C)
    patches = []
    for i in range(kh):                                               # order (kh, kw, c)
        for j in range(kw):
            patches.append(x_nhwc[:, i:i + oh, j:j + ow, :])
    p = jnp.concatenate(patches, axis=-1)                             # (N, OH, OW, K)
    m = n * oh * ow
    k = kh * kw * ic                                                  # 48 (NOT padded)
    p = p.reshape(m, k)                                               # (M, K)

    # ---------- M-tile selection ----------
    # Large tile for DMA/step-overhead amortization, but always >= 2 blocks so
    # the parallel grid axis splits across both TensorCores on v7x.
    half_m = _round_up((m + 1) // 2, 8)
    tm = max(8, min(tm, half_m))
    m_pad = _round_up(m, tm)

    # Only cheap M-row padding remains (no K / OC padding).
    p_pad = jnp.pad(p, ((0, m_pad - m), (0, 0)))
    w_flat = jnp.transpose(weight_oihw, (2, 3, 1, 0)).reshape(k, oc)  # (kh,kw,c) rows -> OC cols
    b_row = bias.reshape(1, oc)

    grid = (m_pad // tm,)

    cost = pl.CostEstimate(
        flops=2 * m * k * oc,
        transcendentals=0,
        bytes_accessed=4 * (m * k + k * oc + oc + m * oc),
    )

    out = pl.pallas_call(
        _matmul_bias_relu6_kernel,
        out_shape=jax.ShapeDtypeStruct((m_pad, oc), jnp.float32),
        grid_spec=pltpu.PrefetchScalarGridSpec(
            num_scalar_prefetch=0,
            grid=grid,
            in_specs=[
                pl.BlockSpec((tm, k), lambda i: (i, 0)),    # patch rows: tiled over M (K full-dim)
                pl.BlockSpec((k, oc), lambda i: (0, 0)),    # weights: resident (full array)
                pl.BlockSpec((1, oc), lambda i: (0, 0)),    # bias: resident (full array)
            ],
            out_specs=pl.BlockSpec((tm, oc), lambda i: (i, 0)),  # OC full-dim, no zero lanes
        ),
        compiler_params=pltpu.CompilerParams(
            dimension_semantics=("parallel",),        # independent M-blocks -> megacore / 2 TC
            vmem_limit_bytes=32 * 1024 * 1024,        # tiny footprint; safe on v7x's 64 MiB
            allow_input_fusion=[True, True, True],    # fuse pad/concat into operand read
        ),
        cost_estimate=cost,
    )(p_pad, w_flat, b_row)

    # ---------- wrapper-side un-pad M rows / reshape / NCHW transpose ----------
    y = out[:m].reshape(n, oh, ow, oc)
    return jnp.transpose(y, (0, 3, 1, 2))                             # (N, OC, OH, OW)


def _reference(x_nchw, weight_oihw, bias):
    y = jax.lax.conv_general_dilated(
        x_nchw, weight_oihw, window_strides=(1, 1), padding="VALID",
        dimension_numbers=("NCHW", "OIHW", "NCHW"))
    y = y + bias.reshape(1, -1, 1, 1)
    return jnp.clip(y, 0.0, 6.0)


if __name__ == "__main__":
    key = jax.random.PRNGKey(0)
    k_x, k_w, k_b = jax.random.split(key, 3)

    # Small shapes consistent with the module: N=2, C=3, H=W=16 -> out (2, 64, 13, 13)
    x = jax.random.normal(k_x, (2, IN_CH, 16, 16), dtype=jnp.float32)
    fan_in = IN_CH * KH * KW
    bound = 1.0 / (fan_in ** 0.5)
    weight = jax.random.uniform(k_w, (OUT_CH, IN_CH, KH, KW),
                                minval=-bound, maxval=bound, dtype=jnp.float32)
    bias = jax.random.uniform(k_b, (OUT_CH,), minval=-bound, maxval=bound,
                              dtype=jnp.float32)

    y = jax.block_until_ready(relu6_conv_block(x, weight, bias))
    y_ref = jax.block_until_ready(_reference(x, weight, bias))

    assert y.shape == (2, OUT_CH, 13, 13)
    assert jnp.max(jnp.abs(y - y_ref)) < 1e-4

    print("KERNEL_OK")
</pallas_src>

<mosaic_0001>
module attributes {stable_mosaic.version = 11 : i64} {
  func.func @_matmul_bias_relu6_kernel(%arg0: i32, %arg1: memref<176x48xf32, #tpu.memory_space<vmem>>, %arg2: memref<48x64xf32, #tpu.memory_space<vmem>>, %arg3: memref<1x64xf32, #tpu.memory_space<vmem>>, %arg4: memref<176x64xf32, #tpu.memory_space<vmem>>) attributes {dimension_semantics = [#tpu.dimension_semantics<parallel>], iteration_bounds = array<i64: 2>, scalar_prefetch = 0 : i64, scratch_operands = 0 : i64, tpu.core_type = #tpu.core_type<tc>, window_params = [{transform_indices = @transform_0, window_bounds = array<i64: 176, 48>}, {pipeline_mode = #tpu.pipeline_mode<synchronous>, transform_indices = @transform_1, window_bounds = array<i64: 48, 64>}, {pipeline_mode = #tpu.pipeline_mode<synchronous>, transform_indices = @transform_2, window_bounds = array<i64: 1, 64>}, {transform_indices = @transform_3, window_bounds = array<i64: 176, 64>}]} {
    %c0 = arith.constant 0 : index
    %c0_0 = arith.constant 0 : index
    %0 = vector.load %arg1[%c0, %c0_0] : memref<176x48xf32, #tpu.memory_space<vmem>>, vector<176x48xf32>
    %c0_1 = arith.constant 0 : index
    %c0_2 = arith.constant 0 : index
    %1 = vector.load %arg2[%c0_1, %c0_2] : memref<48x64xf32, #tpu.memory_space<vmem>>, vector<48x64xf32>
    %cst = arith.constant dense<0.000000e+00> : vector<176x64xf32>
    %2 = tpu.matmul %0, %1, %cst {dimension_numbers = #tpu.dot_dimension_numbers<[1], [0], [0], [1], [0, 0, 1, 1], [], []>} : vector<176x48xf32>, vector<48x64xf32>, vector<176x64xf32> -> vector<176x64xf32>
    %c0_3 = arith.constant 0 : index
    %c0_4 = arith.constant 0 : index
    %3 = vector.load %arg3[%c0_3, %c0_4] : memref<1x64xf32, #tpu.memory_space<vmem>>, vector<1x64xf32>
    %4 = vector.broadcast %3 : vector<1x64xf32> to vector<176x64xf32>
    %5 = arith.addf %2, %4 : vector<176x64xf32>
    %cst_5 = arith.constant 0.000000e+00 : f32
    %cst_6 = arith.constant 6.000000e+00 : f32
    %6 = vector.broadcast %cst_5 : f32 to vector<176x64xf32>
    %7 = arith.maximumf %6, %5 : vector<176x64xf32>
    %8 = vector.broadcast %cst_6 : f32 to vector<176x64xf32>
    %9 = arith.minimumf %8, %7 : vector<176x64xf32>
    %c0_7 = arith.constant 0 : index
    %c0_8 = arith.constant 0 : index
    %10 = vector.load %arg4[%c0_7, %c0_8] : memref<176x64xf32, #tpu.memory_space<vmem>>, vector<176x64xf32>
    tpu.vector_store %arg4[%c0_7, %c0_8], %9 {strides = array<i32>} : memref<176x64xf32, #tpu.memory_space<vmem>>, vector<176x64xf32>,
    return
  }
  func.func @transform_0(%arg0: i32) -> (i32, i32) {
    %c0_i32 = arith.constant 0 : i32
    %c0_i32_0 = arith.constant 0 : i32
    return %arg0, %c0_i32 : i32, i32
  }
  func.func @transform_1(%arg0: i32) -> (i32, i32) {
    %c0_i32 = arith.constant 0 : i32
    %c0_i32_0 = arith.constant 0 : i32
    %c0_i32_1 = arith.constant 0 : i32
    return %c0_i32, %c0_i32_0 : i32, i32
  }
  func.func @transform_2(%arg0: i32) -> (i32, i32) {
    %c0_i32 = arith.constant 0 : i32
    %c0_i32_0 = arith.constant 0 : i32
    %c0_i32_1 = arith.constant 0 : i32
    return %c0_i32, %c0_i32_0 : i32, i32
  }
  func.func @transform_3(%arg0: i32) -> (i32, i32) {
    %c0_i32 = arith.constant 0 : i32
    %c0_i32_0 = arith.constant 0 : i32
    return %arg0, %c0_i32 : i32, i32
  }
}

</mosaic_0001>

<bundles_post_ra>
// kernel: tpu_custom_call.1
= control target key start
LH: loop header
LB: loop body
LE: loop exit
PB: predicated region body
PF: predicated region fallthrough
CT: control target
= control target key end

     0   :  { %s727_s12 = smov 0   ;;  %s888_s0 = inlined_call_operand.vmem [shape: f32[352,48], index: 0, kind: input, shape index: {}]   ;;  %s889_s1 = inlined_call_operand.vmem [shape: f32[48,64], index: 1, kind: input, shape index: {}]   ;;  %s890_s2 = inlined_call_operand.vmem [shape: f32[1,64], index: 2, kind: input, shape index: {}]   ;;  %s891_s3 = inlined_call_operand.vmem [shape: f32[352,64], index: 3, kind: output, shape index: {}]  }
   0x1 LB: > { %s574_s13 = sadd.s32 4294967295, %s705_s12   ;;  %p578_p0 = scmp.ge.s32.totalorder %s705_s12, 1  ;;  %s705_s12 = sphi %s727_s12, %s13_s12  }
   0x2   : > { %p138_p1 = scmp.lt.s32.totalorder %s705_s12, 3 }
   0x4   : > { %p139_p2 = pnand %p578_p0, %p138_p1 }
   0x5   : > { %s162_s18 = smul.u32 (!%p139_p2), 22, %s574_s13 }
   0x6   : > { %142 = sbr.rel (%p139_p2) target bundleno = 246 (0xf6), region = 32 }
   0x7   : > { %p163_p3 = scmp.lt.s32.totalorder (!%p139_p2), %s162_s18, 43 }
   0xb   : > { %v201_v0 = vld [vmem:[%s889_s1 + $0x28] sm:$0xff]  ;;  %v200_v1 = vld [vmem:[%s889_s1 + $0x20] sm:$0xff]  ;;  %v199_v2 = vld [vmem:[%s889_s1 + $0x18] sm:$0xff]  ;;  %s893_s18 = smov (!%p163_p3, %s162_s18), 43  ;;  %vm209_vm0 = vcmask 392192   ;;  %vm495_vm1 = vcmask 523264  }
   0xc   : > { %634 = vmatprep.subr.mxu0 %v201_v0  ;;  %679 = vmatprep.subr.mxu1 %v201_v0  ;;  %v198_v3 = vld [vmem:[%s889_s1 + $0x10] sm:$0xff]  ;;  %v197_v4 = vld [vmem:[%s889_s1 + $0x8] sm:$0xff]  ;;  %s579_s25 = sshll.u32 %s893_s18, 3  ;;  %v196_v5 = vld [vmem:[%s889_s1] sm:$0xff] }
   0xd   : > { %635 = vmatpush3.msra.mxu0 %v201_v0  ;;  %685 = vmatpush3.msra.mxu1 %v201_v0  ;;  %s758_s28 = scalar_lea.vmem %s888_s0, %s579_s25  ;;  %v810_v28 = vld [vmem:[%s890_s2] ss:$0 sm:$0xff]  ;;  %s820_s8 = scalar_lea.vmem %s891_s3, %s579_s25 }
   0xe   : > { %636 = vmatprep.subr.mxu0 %v200_v1  ;;  %680 = vmatprep.subr.mxu1 %v200_v1  ;;  %v174_v6 = vld [vmem:[%s758_s28] sm:$0xff]  ;;  %v175_v7 = vld [vmem:[%s758_s28 + $0x8] sm:$0xff]  ;;  %v176_v9 = vld [vmem:[%s758_s28 + $0x10] sm:$0xff] }
   0xf   : > { %637 = vmatpush3.msra.mxu0 %v200_v1  ;;  %686 = vmatpush3.msra.mxu1 %v200_v1  ;;  %v186_v8 = vld [vmem:[%s758_s28 + $0x60] sm:$0xff]  ;;  %v187_v10 = vld [vmem:[%s758_s28 + $0x68] sm:$0xff]  ;;  %v188_v11 = vld [vmem:[%s758_s28 + $0x70] sm:$0xff] }
  0x10   : > { %638 = vmatprep.subr.mxu0 %v199_v2  ;;  %681 = vmatprep.subr.mxu1 %v199_v2  ;;  %v177_v12 = vld [vmem:[%s758_s28 + $0x18] sm:$0xff]  ;;  %v178_v13 = vld [vmem:[%s758_s28 + $0x20] sm:$0xff]  ;;  %v179_v16 = vld [vmem:[%s758_s28 + $0x28] sm:$0xff] }
  0x11   : > { %639 = vmatpush3.msra.mxu0 %v199_v2  ;;  %687 = vmatpush3.msra.mxu1 %v199_v2  ;;  %v189_v14 = vld [vmem:[%s758_s28 + $0x78] sm:$0xff]  ;;  %v190_v15 = vld [vmem:[%s758_s28 + $0x80] sm:$0xff]  ;;  %v180_v17 = vld [vmem:[%s758_s28 + $0x30] sm:$0xff] }
  0x12   : > { %640 = vmatprep.subr.mxu0 %v198_v3  ;;  %682 = vmatprep.subr.mxu1 %v198_v3  ;;  %v191_v18 = vld [vmem:[%s758_s28 + $0x88] sm:$0xff]  ;;  %v192_v19 = vld [vmem:[%s758_s28 + $0x90] sm:$0xff]  ;;  %v181_v20 = vld [vmem:[%s758_s28 + $0x38] sm:$0xff] }
  0x13   : > { %641 = vmatpush3.msra.mxu0 %v198_v3  ;;  %688 = vmatpush3.msra.mxu1 %v198_v3  ;;  %v182_v21 = vld [vmem:[%s758_s28 + $0x40] sm:$0xff]  ;;  %v193_v22 = vld [vmem:[%s758_s28 + $0x98] sm:$0xff]  ;;  %v183_v24 = vld [vmem:[%s758_s28 + $0x48] sm:$0xff] }
  0x14   : > { %642 = vmatprep.subr.mxu0 %v197_v4  ;;  %683 = vmatprep.subr.mxu1 %v197_v4  ;;  %v194_v23 = vld [vmem:[%s758_s28 + $0xa0] sm:$0xff]  ;;  %v184_v25 = vld [vmem:[%s758_s28 + $0x50] sm:$0xff]  ;;  %v195_v26 = vld [vmem:[%s758_s28 + $0xa8] sm:$0xff] }
  0x15   : > { %643 = vmatpush3.msra.mxu0 %v197_v4  ;;  %689 = vmatpush3.msra.mxu1 %v197_v4  ;;  %v185_v27 = vld [vmem:[%s758_s28 + $0x58] sm:$0xff] }
  0x16   : > { %644 = vmatprep.subr.mxu0 %v196_v5  ;;  %646 = vmatprep.mubr.msk.f32.mxu0 %vm209_vm0, %v174_v6 }
  0x17   : > { %645 = vmatpush3.msra.mxu0 %v196_v5  ;;  %684 = vmatprep.subr.mxu1 %v196_v5 }
  0x18   : > { %647 = vmatmul.mubr.msk.f32.vlgmr.msra.gmra.mxu0 %vm209_vm0, %v175_v7  ;;  %690 = vmatpush3.msra.mxu1 %v196_v5 }
  0x19   : > { %664 = vmatprep.mubr.msk.f32.mxu1 %vm209_vm0, %v186_v8  ;;  %649 = vmatprep.mubr.msk.f32.mxu0 %vm209_vm0, %v176_v9 }
  0x1a   : > { %665 = vmatmul.mubr.msk.f32.vlgmr.msra.gmra.mxu1 %vm209_vm0, %v187_v10 }
  0x1b   : > { %667 = vmatprep.mubr.msk.f32.mxu1 %vm209_vm0, %v188_v11 }
  0x1c   : > { %650 = vmatmul.mubr.msk.f32.gmra.mxu0 %vm209_vm0, %v177_v12 }
  0x1d   : > { %652 = vmatprep.mubr.msk.f32.mxu0 %vm209_vm0, %v178_v13 }
  0x1e   : > { %668 = vmatmul.mubr.msk.f32.gmra.mxu1 %vm209_vm0, %v189_v14 }
  0x1f   : > { %670 = vmatprep.mubr.msk.f32.mxu1 %vm209_vm0, %v190_v15 }
  0x20   : > { %653 = vmatmul.mubr.msk.f32.gmra.mxu0 %vm209_vm0, %v179_v16 }
  0x21   : > { %655 = vmatprep.mubr.msk.f32.mxu0 %vm209_vm0, %v180_v17 }
  0x22   : > { %671 = vmatmul.mubr.msk.f32.gmra.mxu1 %vm209_vm0, %v191_v18 }
  0x23   : > { %673 = vmatprep.mubr.msk.f32.mxu1 %vm209_vm0, %v192_v19 }
  0x24   : > { %656 = vmatmul.mubr.msk.f32.gmra.mxu0 %vm209_vm0, %v181_v20 }
  0x25   : > { %658 = vmatprep.mubr.msk.f32.mxu0 %vm209_vm0, %v182_v21 }
  0x26   : > { %674 = vmatmul.mubr.msk.f32.gmra.mxu1 %vm209_vm0, %v193_v22 }
  0x27   : > { %676 = vmatprep.mubr.msk.f32.mxu1 %vm209_vm0, %v194_v23 }
  0x28   : > { %659 = vmatmul.mubr.msk.f32.gmra.mxu0 %vm209_vm0, %v183_v24 }
  0x29   : > { %661 = vmatprep.mubr.msk.f32.mxu0 %vm209_vm0, %v184_v25 }
  0x2a   : > { %677 = vmatmul.mubr.msk.f32.gmra.mxu1 %vm209_vm0, %v195_v26 }
  0x2c   : > { %662 = vmatmul.mubr.msk.f32.gmra.mxu0 %vm209_vm0, %v185_v27 }
  0xd8   : > { %v648_v29 = vpop.f32.mrf.mxu0 }
  0xd9   : > { %v348_v30 = vadd.f32 %v648_v29, %v810_v28 }
  0xda   : > { %v342_v31 = vpop.f32.mrf.mxu0  ;;  %v666_v32 = vpop.f32.mrf.mxu1 }
  0xdb   : > { %v452_v33 = vmax.f32 %v348_v30, 0.0  ;;  %v343_v34 = vadd.f32 %v810_v28, %v342_v31  ;;  %v408_v35 = vadd.f32 %v666_v32, %v810_v28 }
  0xdc   : > { %v651_v36 = vpop.f32.mrf.mxu0  ;;  %v402_v37 = vpop.f32.mrf.mxu1 }
  0xdd   : > { %v474_v38 = vmin.f32 %v452_v33, 6.0  ;;  %v451_v39 = vmax.f32 %v343_v34, 0.0  ;;  %v464_v40 = vmax.f32 %v408_v35, 0.0  ;;  %v358_v41 = vadd.f32 %v651_v36, %v810_v28 }
  0xde   : > { %v403_v42 = vadd.f32 %v810_v28, %v402_v37  ;;  %v352_v43 = vpop.f32.mrf.mxu0  ;;  %v669_v44 = vpop.f32.mrf.mxu1 }
  0xdf   : > { %497 = vst.msk [vmem:[%s820_s8 + $0x8] sm:$0xff] %vm495_vm1, %v474_v38  ;;  %v473_v45 = vmin.f32 %v451_v39, 6.0  ;;  %v486_v46 = vmin.f32 %v464_v40, 6.0  ;;  %v454_v47 = vmax.f32 %v358_v41, 0.0  ;;  %v353_v48 = vadd.f32 %v810_v28, %v352_v43 }
  0xe0   : > { %v463_v49 = vmax.f32 %v403_v42, 0.0  ;;  %v418_v50 = vadd.f32 %v669_v44, %v810_v28  ;;  %v654_v51 = vpop.f32.mrf.mxu0  ;;  %v412_v52 = vpop.f32.mrf.mxu1 }
  0xe1   : > { %496 = vst.msk [vmem:[%s820_s8] sm:$0xff] %vm495_vm1, %v473_v45  ;;  %509 = vst.msk [vmem:[%s820_s8 + $0x68] sm:$0xff] %vm495_vm1, %v486_v46  ;;  %v476_v53 = vmin.f32 %v454_v47, 6.0  ;;  %v453_v54 = vmax.f32 %v353_v48, 0.0  ;;  %v368_v55 = vadd.f32 %v654_v51, %v810_v28  ;;  %v413_v56 = vadd.f32 %v810_v28, %v412_v52 }
  0xe2   : > { %v485_v57 = vmin.f32 %v463_v49, 6.0  ;;  %v466_v58 = vmax.f32 %v418_v50, 0.0  ;;  %v362_v59 = vpop.f32.mrf.mxu0  ;;  %v672_v60 = vpop.f32.mrf.mxu1 }
  0xe3   : > { %499 = vst.msk [vmem:[%s820_s8 + $0x18] sm:$0xff] %vm495_vm1, %v476_v53  ;;  %v475_v61 = vmin.f32 %v453_v54, 6.0  ;;  %v456_v62 = vmax.f32 %v368_v55, 0.0  ;;  %v465_v63 = vmax.f32 %v413_v56, 0.0  ;;  %v363_v0 = vadd.f32 %v810_v28, %v362_v59 }
  0xe4   : > { %508 = vst.msk [vmem:[%s820_s8 + $0x60] sm:$0xff] %vm495_vm1, %v485_v57  ;;  %v488_v1 = vmin.f32 %v466_v58, 6.0  ;;  %v428_v2 = vadd.f32 %v672_v60, %v810_v28  ;;  %v657_v3 = vpop.f32.mrf.mxu0  ;;  %v422_v4 = vpop.f32.mrf.mxu1 }
  0xe5   : > { %498 = vst.msk [vmem:[%s820_s8 + $0x10] sm:$0xff] %vm495_vm1, %v475_v61  ;;  %v478_v5 = vmin.f32 %v456_v62, 6.0  ;;  %v487_v6 = vmin.f32 %v465_v63, 6.0  ;;  %v455_v7 = vmax.f32 %v363_v0, 0.0  ;;  %v378_v8 = vadd.f32 %v657_v3, %v810_v28 }
  0xe6   : > { %511 = vst.msk [vmem:[%s820_s8 + $0x78] sm:$0xff] %vm495_vm1, %v488_v1  ;;  %v468_v9 = vmax.f32 %v428_v2, 0.0  ;;  %v423_v10 = vadd.f32 %v810_v28, %v422_v4  ;;  %v372_v11 = vpop.f32.mrf.mxu0  ;;  %v675_v12 = vpop.f32.mrf.mxu1 }
  0xe7   : > { %501 = vst.msk [vmem:[%s820_s8 + $0x28] sm:$0xff] %vm495_vm1, %v478_v5  ;;  %510 = vst.msk [vmem:[%s820_s8 + $0x70] sm:$0xff] %vm495_vm1, %v487_v6  ;;  %v477_v13 = vmin.f32 %v455_v7, 6.0  ;;  %v458_v14 = vmax.f32 %v378_v8, 0.0  ;;  %v373_v15 = vadd.f32 %v810_v28, %v372_v11  ;;  %v438_v16 = vadd.f32 %v675_v12, %v810_v28 }
  0xe8   : > { %v490_v17 = vmin.f32 %v468_v9, 6.0  ;;  %v467_v18 = vmax.f32 %v423_v10, 0.0  ;;  %v660_v19 = vpop.f32.mrf.mxu0  ;;  %v432_v20 = vpop.f32.mrf.mxu1 }
  0xe9   : > { %500 = vst.msk [vmem:[%s820_s8 + $0x20] sm:$0xff] %vm495_vm1, %v477_v13  ;;  %v480_v21 = vmin.f32 %v458_v14, 6.0  ;;  %v457_v22 = vmax.f32 %v373_v15, 0.0  ;;  %v470_v23 = vmax.f32 %v438_v16, 0.0  ;;  %v388_v24 = vadd.f32 %v660_v19, %v810_v28 }
  0xea   : > { %513 = vst.msk [vmem:[%s820_s8 + $0x88] sm:$0xff] %vm495_vm1, %v490_v17  ;;  %v489_v25 = vmin.f32 %v467_v18, 6.0  ;;  %v433_v26 = vadd.f32 %v810_v28, %v432_v20  ;;  %v382_v27 = vpop.f32.mrf.mxu0  ;;  %v678_v29 = vpop.f32.mrf.mxu1 }
  0xeb   : > { %503 = vst.msk [vmem:[%s820_s8 + $0x38] sm:$0xff] %vm495_vm1, %v480_v21  ;;  %v479_v30 = vmin.f32 %v457_v22, 6.0  ;;  %v492_v31 = vmin.f32 %v470_v23, 6.0  ;;  %v460_v32 = vmax.f32 %v388_v24, 0.0  ;;  %v383_v33 = vadd.f32 %v810_v28, %v382_v27 }
  0xec   : > { %512 = vst.msk [vmem:[%s820_s8 + $0x80] sm:$0xff] %vm495_vm1, %v489_v25  ;;  %v469_v34 = vmax.f32 %v433_v26, 0.0  ;;  %v448_v35 = vadd.f32 %v678_v29, %v810_v28  ;;  %v663_v36 = vpop.f32.mrf.mxu0  ;;  %v442_v37 = vpop.f32.mrf.mxu1 }
  0xed   : > { %502 = vst.msk [vmem:[%s820_s8 + $0x30] sm:$0xff] %vm495_vm1, %v479_v30  ;;  %515 = vst.msk [vmem:[%s820_s8 + $0x98] sm:$0xff] %vm495_vm1, %v492_v31  ;;  %v482_v38 = vmin.f32 %v460_v32, 6.0  ;;  %v459_v39 = vmax.f32 %v383_v33, 0.0  ;;  %v398_v40 = vadd.f32 %v663_v36, %v810_v28  ;;  %v443_v41 = vadd.f32 %v810_v28, %v442_v37 }
  0xee   : > { %v491_v42 = vmin.f32 %v469_v34, 6.0  ;;  %v472_v43 = vmax.f32 %v448_v35, 0.0  ;;  %v392_v44 = vpop.f32.mrf.mxu0 }
  0xef   : > { %505 = vst.msk [vmem:[%s820_s8 + $0x48] sm:$0xff] %vm495_vm1, %v482_v38  ;;  %v481_v45 = vmin.f32 %v459_v39, 6.0  ;;  %v462_v46 = vmax.f32 %v398_v40, 0.0  ;;  %v471_v47 = vmax.f32 %v443_v41, 0.0  ;;  %v393_v48 = vadd.f32 %v810_v28, %v392_v44 }
  0xf0   : > { %514 = vst.msk [vmem:[%s820_s8 + $0x90] sm:$0xff] %vm495_vm1, %v491_v42  ;;  %v494_v49 = vmin.f32 %v472_v43, 6.0 }
  0xf1   : > { %504 = vst.msk [vmem:[%s820_s8 + $0x40] sm:$0xff] %vm495_vm1, %v481_v45  ;;  %v484_v50 = vmin.f32 %v462_v46, 6.0  ;;  %v493_v51 = vmin.f32 %v471_v47, 6.0  ;;  %v461_v52 = vmax.f32 %v393_v48, 0.0 }
  0xf2   : > { %517 = vst.msk [vmem:[%s820_s8 + $0xa8] sm:$0xff] %vm495_vm1, %v494_v49 }
  0xf3   : > { %507 = vst.msk [vmem:[%s820_s8 + $0x58] sm:$0xff] %vm495_vm1, %v484_v50  ;;  %516 = vst.msk [vmem:[%s820_s8 + $0xa0] sm:$0xff] %vm495_vm1, %v493_v51  ;;  %v483_v53 = vmin.f32 %v461_v52, 6.0 }
  0xf5   : > { %506 = vst.msk [vmem:[%s820_s8 + $0x50] sm:$0xff] %vm495_vm1, %v483_v53 }
  0xf6 PF: > { %s13_s12 = sadd.s32 1, %s705_s12  }
  0xf7   : > { %p10_p4 = scmp.ge.s32.totalorder %s13_s12, 4  }
  0xf9   :  { %12 = sbr.rel (!%p10_p4) target bundleno = 1 (0x1), region = 62 }

</bundles_post_ra>
